<compile_context>
chip_gen: v7x
topology: tpu7x:2x2x1
jax: 0.10.0
libtpu: 0.0.40
codegen_flags: <defaults>
</compile_context>

<pallas_src>
import jax
import jax.numpy as jnp
from jax import lax
from jax.experimental import pallas as pl
from jax.experimental.pallas import tpu as pltpu

BN_EPS = 1e-5                                # PyTorch BatchNorm default eps
_BN_INV = 1.0 / (1.0 + BN_EPS) ** 0.5        # eval-mode BN scale (running mean=0, var=1)
_HI = jax.lax.Precision.HIGHEST
_VMEM_LIMIT = 48 * 1024 * 1024               # safe on v5e/v6e (128 MiB) and v7x (64 MiB)


def _pick_tile(n, candidates=(512, 256, 128)):
    """Largest lane-friendly tile that divides n; falls back to n (see TODO about padding)."""
    for t in candidates:
        if n % t == 0:
            return t
    return n


# ----------------------------------------------------------------------------
# Kernel 1: pairwise (negative) squared distances, tiled over (B, N, N)
# ----------------------------------------------------------------------------
def _pairwise_kernel(xi_ref, xj_ref, xxc_ref, xxr_ref, out_ref):
    # contract over D (dim 0 of both operands): no wrapper transpose of x needed
    inner = lax.dot_general(xi_ref[0], xj_ref[0],
                            dimension_numbers=(((0,), (0,)), ((), ())),
                            preferred_element_type=jnp.float32)          # (TI, TJ)
    # row norms are precomputed once in the wrapper (hoisted out of the grid loop)
    out_ref[0] = 2.0 * inner - xxc_ref[0] - xxr_ref[0]                   # -||xi - xj||^2


def pairwise_neg_sqdist(x):
    """x: (B, D, N) -> (B, N, N) negative squared pairwise distances (f32)."""
    B, D, N = x.shape
    tile = _pick_tile(N)
    xx = jnp.sum(x * x, axis=1, keepdims=True)                           # (B, 1, N)
    xx_col = jnp.transpose(xx, (0, 2, 1))                                # (B, N, 1)  (tiny)
    return pl.pallas_call(
        _pairwise_kernel,
        out_shape=jax.ShapeDtypeStruct((B, N, N), jnp.float32),
        grid=(B, N // tile, N // tile),
        in_specs=[
            pl.BlockSpec((1, D, tile), lambda b, i, j: (b, 0, i)),       # x, i-tile
            pl.BlockSpec((1, D, tile), lambda b, i, j: (b, 0, j)),       # x, j-tile
            pl.BlockSpec((1, tile, 1), lambda b, i, j: (b, i, 0)),       # ||x_i||^2
            pl.BlockSpec((1, 1, tile), lambda b, i, j: (b, 0, j)),       # ||x_j||^2
        ],
        out_specs=pl.BlockSpec((1, tile, tile), lambda b, i, j: (b, i, j)),
        compiler_params=pltpu.CompilerParams(
            dimension_semantics=("parallel", "parallel", "parallel")),
    )(x, x, xx_col, xx)


def _knn(x, k):
    """Shared kNN: Pallas pairwise distances + JAX top_k (data dependent)."""
    pd = pairwise_neg_sqdist(x)
    neg_d, idx = jax.lax.top_k(pd, k)          # TODO(synk): top_k has no clean Pallas equivalent
    return -neg_d, idx                         # (B, N, K) sq distances, (B, N, K) indices


# ----------------------------------------------------------------------------
# Kernel 2: MolConv prepass — first gram column `sub` + F.normalize denominator
# ----------------------------------------------------------------------------
def _subnorm_kernel(gf_ref, sub_ref, invn_ref, acc_ref):
    t = pl.program_id(1)
    gf = gf_ref[0].astype(jnp.float32)                                    # (D, K, TN)
    # one vectorized multiply + cross-vreg reduce over D (no per-neighbor XLU reduces)
    sub = jnp.sum(gf * gf[:, 0:1, :], axis=0)                             # (K, TN)
    sub_ref[0] = sub

    # F.normalize(dim=point axis) denominator: nrm2[i,j] = sum_n sub[i,n]^2 sub[j,n]^2
    subsq = sub * sub
    part = lax.dot_general(subsq, subsq,
                           dimension_numbers=(((1,), (1,)), ((), ())),
                           preferred_element_type=jnp.float32)            # (K, K)

    @pl.when(t == 0)
    def _():
        acc_ref[...] = jnp.zeros_like(acc_ref)

    acc_ref[...] += part

    @pl.when(t == pl.num_programs(1) - 1)
    def _():
        invn_ref[0] = 1.0 / jnp.maximum(jnp.sqrt(acc_ref[...]), 1e-12)


# ----------------------------------------------------------------------------
# Kernel 3: fused MolConv body (per batch element x N-tile, channel-first, N on lanes)
# ----------------------------------------------------------------------------
def _molconv_kernel(gf_ref, xc_ref, dist_ref, sub_ref, invn_ref, wd_ref,
                    wc_ref, wuc_ref, wuf_ref, wug_ref, out_ref):
    k = gf_ref.shape[2]

    xc = xc_ref[0]                              # (D, TN)    center features (f32)
    dist = dist_ref[0]                          # (K, TN)    squared kNN distances
    sub = sub_ref[0]                            # (K, TN)    first gram column (prepass)
    invn = invn_ref[0]                          # (K, K)     1 / F.normalize denominator
    wd = wd_ref[0, 0]                           # scalar     dist_ff weight (BN folded)
    wc = wc_ref[...]                            # (Dc+K, D)  center_ff weight (padded, BN folded)
    wu_c = wuc_ref[...]                         # (out, Dc+K) update_ff weight (BN folded)
    wu_f = wuf_ref[...]                         # (out, D)   update_ff | neighbor-feat cols (bf16)
    wu_g = wug_ref[...]                         # (out, K)   update_ff | gm2 cols

    def sigmoid(z):                             # exp -> EUP, reciprocal -> EUP (off the VALU)
        return pl.reciprocal(1.0 + jnp.exp(-z), approx=True)

    # center path: update_ff applied once to sigmoid(center_ff(x))
    feat_c = sigmoid(jnp.dot(wc, xc, preferred_element_type=jnp.float32))     # (Dc+K, TN)
    cfc = jnp.dot(wu_c, feat_c, preferred_element_type=jnp.float32)           # (out, TN)

    # distance gate
    w = sigmoid(dist * wd)                                                    # (K, TN)

    # Per neighbor i:
    #   upd_i = w_i * (Wu_f @ gf_i + sub_i * ((Wu_g * inv_nrm_i) @ sub)) + cfc
    # == update_ff(w * cat(feat_n, gm2) + feat_c) without materializing gm2, the channel
    # concat, or any (., K, N) temporaries.  Accumulating through the output ref keeps each
    # iteration's (out, TN) temporaries dead before the next one (bounded live ranges).
    out_ref[0] = jnp.zeros(out_ref.shape[1:], out_ref.dtype)
    for i in range(k):
        un = jnp.dot(wu_f, gf_ref[0, :, i, :],
                     preferred_element_type=jnp.float32)                      # (out, TN) bf16 MXU
        t = jnp.dot(wu_g * invn[i:i + 1, :], sub,
                    preferred_element_type=jnp.float32)                       # (out, TN)
        upd = w[i:i + 1, :] * (un + sub[i:i + 1, :] * t) + cfc
        out_ref[0] += jnp.where(upd >= 0, upd, 0.02 * upd)                    # LeakyReLU(0.02)
    out_ref[0] *= 1.0 / k                                                     # mean over K


def mol_conv_forward(x, idx_base, p, k):
    """One MolConv layer.  x: (B, in_dim, N) f32 -> (B, out_dim, N) f32, channel-first."""
    del idx_base                       # per-batch vmap gather already handles batch offsets
    B, D, N = x.shape
    out_dim, dck = p["wu_c"].shape

    dist, idx = _knn(x, k)                                             # (B, N, K) each
    dist_kn = jnp.transpose(dist, (0, 2, 1))                           # (B, K, N)   (small)
    # neighbor gather in its natural layout (no HBM transpose); bf16 halves HBM traffic
    gf = jax.vmap(lambda xb, ib: jnp.take(xb, ib.T, axis=1))(x, idx)   # (B, D, K, N)
    gf = gf.astype(jnp.bfloat16)

    tn = _pick_tile(N)
    nt = N // tn

    # Pass 1: `sub` + the K x K normalization denominator (needs a full reduction over N).
    sub, inv_nrm = pl.pallas_call(
        _subnorm_kernel,
        out_shape=(jax.ShapeDtypeStruct((B, k, N), jnp.float32),
                   jax.ShapeDtypeStruct((B, k, k), jnp.float32)),
        grid=(B, nt),
        in_specs=[pl.BlockSpec((1, D, k, tn), lambda b, t: (b, 0, 0, t))],
        out_specs=(pl.BlockSpec((1, k, tn), lambda b, t: (b, 0, t)),
                   pl.BlockSpec((1, k, k), lambda b, t: (b, 0, 0))),
        scratch_shapes=[pltpu.VMEM((k, k), jnp.float32)],
        compiler_params=pltpu.CompilerParams(
            dimension_semantics=("parallel", "arbitrary"),
            vmem_limit_bytes=_VMEM_LIMIT),
    )(gf)

    # Pass 2: fused MolConv body — fully per-point, so B and the N tiles are both 'parallel'.
    return pl.pallas_call(
        _molconv_kernel,
        out_shape=jax.ShapeDtypeStruct((B, out_dim, N), jnp.float32),
        grid=(B, nt),
        in_specs=[
            pl.BlockSpec((1, D, k, tn), lambda b, t: (b, 0, 0, t)),    # neighbor feats (bf16)
            pl.BlockSpec((1, D, tn), lambda b, t: (b, 0, t)),          # center feats
            pl.BlockSpec((1, k, tn), lambda b, t: (b, 0, t)),          # squared distances
            pl.BlockSpec((1, k, tn), lambda b, t: (b, 0, t)),          # first gram column
            pl.BlockSpec((1, k, k), lambda b, t: (b, 0, 0)),           # 1 / normalize denom
            pl.BlockSpec(memory_space=pltpu.MemorySpace.SMEM),         # dist_ff scalar weight
            pl.BlockSpec((dck, D), lambda b, t: (0, 0)),               # center_ff weight
            pl.BlockSpec((out_dim, dck), lambda b, t: (0, 0)),         # update_ff weight
            pl.BlockSpec((out_dim, D), lambda b, t: (0, 0)),           # update_ff | neigh cols
            pl.BlockSpec((out_dim, k), lambda b, t: (0, 0)),           # update_ff | gm2 cols
        ],
        out_specs=pl.BlockSpec((1, out_dim, tn), lambda b, t: (b, 0, t)),  # lane-dense on N
        compiler_params=pltpu.CompilerParams(
            dimension_semantics=("parallel", "parallel"),
            vmem_limit_bytes=_VMEM_LIMIT),
    )(gf, x, dist_kn, sub, inv_nrm, p["w_dist"], p["wc"], p["wu_c"], p["wu_f"], p["wu_g"])


# ----------------------------------------------------------------------------
# Kernel 4: Encoder epilogue — streaming max+avg pool over points, Linear+BN(eval)+LeakyReLU.
# Per-layer outputs are pooled separately (pooling commutes with the channel concat), so the
# (B, emb_dim, N) concat never hits HBM.
# ----------------------------------------------------------------------------
def _make_merge_kernel(n_layers, inv_n):
    def kernel(*refs):
        x_refs = refs[:n_layers]
        w_ref, b_ref, out_ref = refs[n_layers:n_layers + 3]
        mx = refs[n_layers + 3:n_layers + 3 + n_layers]
        sm = refs[n_layers + 3 + n_layers:]
        ni = pl.program_id(1)

        @pl.when(ni == 0)
        def _():
            for l in range(n_layers):
                mx[l][...] = jnp.full(mx[l].shape, -jnp.inf, mx[l].dtype)
                sm[l][...] = jnp.zeros(sm[l].shape, sm[l].dtype)

        for l in range(n_layers):
            xl = x_refs[l][...]                                           # (TB, E_l, TN)
            mx[l][...] = jnp.maximum(mx[l][...], jnp.max(xl, axis=-1))
            sm[l][...] = sm[l][...] + jnp.sum(xl, axis=-1)

        @pl.when(ni == pl.num_programs(1) - 1)
        def _():
            p = jnp.concatenate([mx[l][...] + sm[l][...] * inv_n
                                 for l in range(n_layers)], axis=-1)      # (TB, E)
            y = jnp.dot(p, w_ref[...], preferred_element_type=jnp.float32) + b_ref[...]
            out_ref[...] = jnp.where(y >= 0, y, 0.2 * y)                  # LeakyReLU(0.2)

    return kernel


def merge_forward(xs, p):
    B, _, N = xs[0].shape
    e_dims = [int(h.shape[1]) for h in xs]
    E = sum(e_dims)
    tn = _pick_tile(N)
    nt = N // tn
    tb = 8 if B % 8 == 0 else B

    in_specs = [pl.BlockSpec((tb, e, tn), lambda bi, ni: (bi, 0, ni)) for e in e_dims]
    in_specs += [pl.BlockSpec((E, E), lambda bi, ni: (0, 0)),
                 pl.BlockSpec((1, E), lambda bi, ni: (0, 0))]
    scratch = ([pltpu.VMEM((tb, e), jnp.float32) for e in e_dims]      # running max
               + [pltpu.VMEM((tb, e), jnp.float32) for e in e_dims])   # running sum
    return pl.pallas_call(
        _make_merge_kernel(len(xs), 1.0 / N),
        out_shape=jax.ShapeDtypeStruct((B, E), jnp.float32),
        grid=(B // tb, nt),
        in_specs=in_specs,
        out_specs=pl.BlockSpec((tb, E), lambda bi, ni: (bi, 0)),
        scratch_shapes=scratch,
        compiler_params=pltpu.CompilerParams(
            dimension_semantics=("parallel", "arbitrary"),
            vmem_limit_bytes=_VMEM_LIMIT),
    )(*xs, p["w_t"], p["b"])


def encoder_forward(x, idx_base, params, k):
    xs = []
    h = x
    for lp in params["molconv"]:
        h = mol_conv_forward(h, idx_base, lp, k)
        xs.append(h)
    return merge_forward(xs, params["merge"])


# ----------------------------------------------------------------------------
# Parameter init (mirrors kaiming_normal_(a=0.2, fan_in)) + BN folding / padding
# ----------------------------------------------------------------------------
def init_molconv(key, in_dim, out_dim, k, remove_xyz):
    gain = (2.0 / (1.0 + 0.2 ** 2)) ** 0.5
    off = 3 if remove_xyz else 0
    dc = in_dim - off
    kd, kc, ku = jax.random.split(key, 3)
    return {
        "w_dist": jax.random.normal(kd, (1, 1), jnp.float32) * gain,
        "w_center": jax.random.normal(kc, (dc + k, dc), jnp.float32) * (gain / dc ** 0.5),
        "w_update": jax.random.normal(ku, (out_dim, dc + k), jnp.float32) * (gain / (dc + k) ** 0.5),
        "remove_xyz": remove_xyz,
        "in_dim": in_dim,
    }


def prep_molconv(raw, k):
    """Fold eval-mode BatchNorm into the 1x1 conv weights and pad the feature columns up to
    the full in_dim so the kernel never slices channels.  wu_f is bf16 (matmul partner of gf)."""
    in_dim = raw["in_dim"]
    off = 3 if raw["remove_xyz"] else 0
    dc = in_dim - off
    wc = raw["w_center"] * _BN_INV
    wu = raw["w_update"] * _BN_INV
    out_dim = wu.shape[0]
    wu_f = jnp.zeros((out_dim, in_dim), jnp.float32).at[:, off:].set(wu[:, :dc])
    return {
        "w_dist": raw["w_dist"] * _BN_INV,                                          # (1, 1)
        "wc": jnp.zeros((dc + k, in_dim), jnp.float32).at[:, off:].set(wc),         # (Dc+K, D)
        "wu_c": wu,                                                                 # (out, Dc+K)
        "wu_f": wu_f.astype(jnp.bfloat16),                                          # (out, D)
        "wu_g": wu[:, dc:],                                                         # (out, K)
    }


def init_merge(key, emb_dim):
    gain = (2.0 / (1.0 + 0.2 ** 2)) ** 0.5
    kw, kb = jax.random.split(key)
    bound = 1.0 / emb_dim ** 0.5
    return {
        "w": jax.random.normal(kw, (emb_dim, emb_dim), jnp.float32) * (gain / emb_dim ** 0.5),
        "b": jax.random.uniform(kb, (emb_dim,), jnp.float32, -bound, bound),
    }


def prep_merge(raw):
    return {"w_t": (raw["w"].T * _BN_INV).astype(jnp.float32),
            "b": (raw["b"] * _BN_INV).reshape(1, -1).astype(jnp.float32)}


# ----------------------------------------------------------------------------
# Pure-JAX mirrors of the PyTorch forward (eval-mode BN) for correctness checks
# ----------------------------------------------------------------------------
def _pairwise_ref(x):
    inner = jnp.einsum("bdi,bdj->bij", x, x, precision=_HI)
    xx = jnp.sum(x * x, axis=1)
    return 2.0 * inner - xx[:, :, None] - xx[:, None, :]


def _molconv_ref(x, raw, k):
    off = 3 if raw["remove_xyz"] else 0
    dist, idx = _knn(x, k)                                           # same kNN as kernel path
    xt = jnp.transpose(x, (0, 2, 1))                                 # (B, N, D)
    graph_feat = jax.vmap(lambda xb, ib: xb[ib])(xt, idx)            # (B, N, K, D)

    gm = jnp.einsum("bnid,bnjd->bnij", graph_feat, graph_feat, precision=_HI)
    sub = gm[..., 0]                                                 # (B, N, K)
    sub_gm = sub[..., :, None] * sub[..., None, :]                   # (B, N, K, K)
    nrm = jnp.sqrt(jnp.sum(sub_gm * sub_gm, axis=1, keepdims=True))  # F.normalize(dim=1)
    gm2 = sub_gm / jnp.maximum(nrm, 1e-12)

    feat_n = jnp.concatenate([graph_feat[..., off:], gm2], axis=-1)             # (B, N, K, Dc+K)
    c_lin = jnp.einsum("cd,bnd->bnc", raw["w_center"], xt[..., off:], precision=_HI)
    feat_c = jax.nn.sigmoid(c_lin * _BN_INV)                                    # (B, N, Dc+K)
    w = jax.nn.sigmoid(dist * raw["w_dist"][0, 0] * _BN_INV)                    # (B, N, K)

    feat = w[..., None] * feat_n + feat_c[:, :, None, :]
    upd = jnp.einsum("oc,bnkc->bnko", raw["w_update"], feat, precision=_HI) * _BN_INV
    upd = jnp.where(upd >= 0, upd, 0.02 * upd)
    return jnp.transpose(jnp.mean(upd, axis=2), (0, 2, 1))                      # (B, out, N)


def _merge_ref(xcat, raw):
    p = jnp.max(xcat, axis=-1) + jnp.mean(xcat, axis=-1)
    y = (jnp.dot(p, raw["w"].T, precision=_HI) + raw["b"]) * _BN_INV
    return jnp.where(y >= 0, y, 0.2 * y)


# ----------------------------------------------------------------------------
if __name__ == "__main__":
    B, in_dim, N, K = 2, 8, 16, 4
    layers = [16, 16]
    emb_dim = sum(layers)                       # merge Linear is emb_dim -> emb_dim

    key = jax.random.PRNGKey(0)
    kx, k0, k1, km = jax.random.split(key, 4)
    x = jax.random.normal(kx, (B, in_dim, N), dtype=jnp.float32)
    idx_base = (jnp.arange(B) * N).reshape(B, 1, 1)

    raw = {
        "molconv": [init_molconv(k0, in_dim, layers[0], K, remove_xyz=True),
                    init_molconv(k1, layers[0], layers[1], K, remove_xyz=False)],
        "merge": init_merge(km, emb_dim),
    }
    params = {
        "molconv": [prep_molconv(r, K) for r in raw["molconv"]],
        "merge": prep_merge(raw["merge"]),
    }

    out = encoder_forward(x, idx_base, params, K)
    out = jax.block_until_ready(out)
    assert out.shape == (B, emb_dim), out.shape
    assert bool(jnp.all(jnp.isfinite(out)))

    # --- correctness checks against the pure-JAX mirror of the PyTorch forward ---
    pd = pairwise_neg_sqdist(x)
    assert jnp.allclose(pd, _pairwise_ref(x), rtol=5e-2, atol=5e-1), "pairwise mismatch"

    h1 = mol_conv_forward(x, idx_base, params["molconv"][0], K)
    assert jnp.allclose(h1, _molconv_ref(x, raw["molconv"][0], K),
                        rtol=5e-2, atol=5e-2), "molconv layer 0 mismatch"
    h2 = mol_conv_forward(h1, idx_base, params["molconv"][1], K)
    assert jnp.allclose(h2, _molconv_ref(h1, raw["molconv"][1], K),
                        rtol=5e-2, atol=5e-2), "molconv layer 1 mismatch"
    xcat = jnp.concatenate([h1, h2], axis=1)
    assert jnp.allclose(out, _merge_ref(xcat, raw["merge"]),
                        rtol=5e-2, atol=5e-2), "merge mismatch"

    print("KERNEL_OK")
</pallas_src>

<mosaic_0001>
module attributes {stable_mosaic.version = 11 : i64} {
  func.func @_pairwise_kernel(%arg0: i32, %arg1: i32, %arg2: i32, %arg3: memref<1x8x16xf32, #tpu.memory_space<vmem>>, %arg4: memref<1x8x16xf32, #tpu.memory_space<vmem>>, %arg5: memref<1x16x1xf32, #tpu.memory_space<vmem>>, %arg6: memref<1x1x16xf32, #tpu.memory_space<vmem>>, %arg7: memref<1x16x16xf32, #tpu.memory_space<vmem>>) attributes {dimension_semantics = [#tpu.dimension_semantics<parallel>, #tpu.dimension_semantics<parallel>, #tpu.dimension_semantics<parallel>], iteration_bounds = array<i64: 2, 1, 1>, scalar_prefetch = 0 : i64, scratch_operands = 0 : i64, tpu.core_type = #tpu.core_type<tc>, window_params = [{transform_indices = @transform_0, window_bounds = array<i64: 1, 8, 16>}, {transform_indices = @transform_1, window_bounds = array<i64: 1, 8, 16>}, {transform_indices = @transform_2, window_bounds = array<i64: 1, 16, 1>}, {transform_indices = @transform_3, window_bounds = array<i64: 1, 1, 16>}, {transform_indices = @transform_4, window_bounds = array<i64: 1, 16, 16>}]} {
    %c0 = arith.constant 0 : index
    %c0_0 = arith.constant 0 : index
    %c0_1 = arith.constant 0 : index
    %0 = vector.load %arg3[%c0, %c0_0, %c0_1] : memref<1x8x16xf32, #tpu.memory_space<vmem>>, vector<1x8x16xf32>
    %1 = vector.shape_cast %0 : vector<1x8x16xf32> to vector<8x16xf32>
    %c0_2 = arith.constant 0 : index
    %c0_3 = arith.constant 0 : index
    %c0_4 = arith.constant 0 : index
    %2 = vector.load %arg4[%c0_2, %c0_3, %c0_4] : memref<1x8x16xf32, #tpu.memory_space<vmem>>, vector<1x8x16xf32>
    %3 = vector.shape_cast %2 : vector<1x8x16xf32> to vector<8x16xf32>
    %cst = arith.constant dense<0.000000e+00> : vector<16x16xf32>
    %4 = tpu.matmul %1, %3, %cst {dimension_numbers = #tpu.dot_dimension_numbers<[0], [0], [1], [1], [0, 1, 1, 1], [], []>} : vector<8x16xf32>, vector<8x16xf32>, vector<16x16xf32> -> vector<16x16xf32>
    %cst_5 = arith.constant 2.000000e+00 : f32
    %5 = vector.broadcast %cst_5 : f32 to vector<16x16xf32>
    %6 = arith.mulf %5, %4 : vector<16x16xf32>
    %c0_6 = arith.constant 0 : index
    %c0_7 = arith.constant 0 : index
    %c0_8 = arith.constant 0 : index
    %7 = vector.load %arg5[%c0_6, %c0_7, %c0_8] : memref<1x16x1xf32, #tpu.memory_space<vmem>>, vector<1x16x1xf32>
    %8 = vector.shape_cast %7 : vector<1x16x1xf32> to vector<16x1xf32>
    %9 = vector.broadcast %8 : vector<16x1xf32> to vector<16x16xf32>
    %10 = arith.subf %6, %9 : vector<16x16xf32>
    %c0_9 = arith.constant 0 : index
    %c0_10 = arith.constant 0 : index
    %c0_11 = arith.constant 0 : index
    %11 = vector.load %arg6[%c0_9, %c0_10, %c0_11] : memref<1x1x16xf32, #tpu.memory_space<vmem>>, vector<1x1x16xf32>
    %12 = vector.shape_cast %11 : vector<1x1x16xf32> to vector<1x16xf32>
    %13 = vector.broadcast %12 : vector<1x16xf32> to vector<16x16xf32>
    %14 = arith.subf %10, %13 : vector<16x16xf32>
    %c0_12 = arith.constant 0 : index
    %c0_13 = arith.constant 0 : index
    %c0_14 = arith.constant 0 : index
    %15 = vector.load %arg7[%c0_12, %c0_13, %c0_14] : memref<1x16x16xf32, #tpu.memory_space<vmem>>, vector<1x16x16xf32>
    %16 = vector.shape_cast %15 : vector<1x16x16xf32> to vector<16x16xf32>
    %17 = vector.shape_cast %14 : vector<16x16xf32> to vector<1x16x16xf32>
    tpu.vector_store %arg7[%c0_12, %c0_13, %c0_14], %17 {strides = array<i32>} : memref<1x16x16xf32, #tpu.memory_space<vmem>>, vector<1x16x16xf32>,
    return
  }
  func.func @transform_0(%arg0: i32, %arg1: i32, %arg2: i32) -> (i32, i32, i32) {
    %c0_i32 = arith.constant 0 : i32
    %c0_i32_0 = arith.constant 0 : i32
    return %arg0, %c0_i32, %arg1 : i32, i32, i32
  }
  func.func @transform_1(%arg0: i32, %arg1: i32, %arg2: i32) -> (i32, i32, i32) {
    %c0_i32 = arith.constant 0 : i32
    %c0_i32_0 = arith.constant 0 : i32
    return %arg0, %c0_i32, %arg2 : i32, i32, i32
  }
  func.func @transform_2(%arg0: i32, %arg1: i32, %arg2: i32) -> (i32, i32, i32) {
    %c0_i32 = arith.constant 0 : i32
    %c0_i32_0 = arith.constant 0 : i32
    return %arg0, %arg1, %c0_i32 : i32, i32, i32
  }
  func.func @transform_3(%arg0: i32, %arg1: i32, %arg2: i32) -> (i32, i32, i32) {
    %c0_i32 = arith.constant 0 : i32
    %c0_i32_0 = arith.constant 0 : i32
    return %arg0, %c0_i32, %arg2 : i32, i32, i32
  }
  func.func @transform_4(%arg0: i32, %arg1: i32, %arg2: i32) -> (i32, i32, i32) {
    %c0_i32 = arith.constant 0 : i32
    return %arg0, %arg1, %arg2 : i32, i32, i32
  }
}

</mosaic_0001>

<bundles_post_ra>
// kernel: tpu_custom_call.1
= control target key start
LH: loop header
LB: loop body
LE: loop exit
PB: predicated region body
PF: predicated region fallthrough
CT: control target
= control target key end

     0   :  { %9 = vsyncpa [#allocation3], 0  ;;  %s930_s0 = inlined_call_operand.vmem [shape: f32[2,8,16], index: 0, kind: input, shape index: {}]   ;;  %s931_s1 = inlined_call_operand.vmem [shape: f32[2,8,16], index: 1, kind: input, shape index: {}]   ;;  %s932_s2 = inlined_call_operand.vmem [shape: f32[2,16,1], index: 2, kind: input, shape index: {}]   ;;  %s933_s3 = inlined_call_operand.vmem [shape: f32[2,1,16], index: 3, kind: input, shape index: {}]   ;;  %s934_s4 = inlined_call_operand.hbm [shape: f32[2,16,16], index: 4, kind: output, shape index: {}]  }
   0x1   :  { %11 = vsyncpa [#allocation3 + $0x1], 0  ;;  %s801_s15 = smov 0   ;;  %s803_s16 = smov 0  }
   0x2   :  { %s805_s17 = smov 0   ;;  %s807_s18 = smov 0  }
   0x3   :  { %s809_s19 = smov 0   ;;  %s811_s20 = smov 0  }
   0x4 LB: > { %s603_s21 = sadd.s32 4294967295, %s770_s20   ;;  %s604_s22 = sadd.s32 4294967294, %s770_s20   ;;  %s770_s20 = sphi %s811_s20, %s17_s20   ;;  %s766_s19 = sphi %s809_s19, %s941_s19   ;;  %s762_s18 = sphi %s807_s18, %s940_s18   ;;  %s758_s17 = sphi %s805_s17, %s939_s17   ;;  %s754_s16 = sphi %s803_s16, %s938_s16   ;;  %s750_s15 = sphi %s801_s15, %s937_s15  }
   0x5   : > { %s36_s23 = sadd.s32 1, %s766_s19  ;;  %s159_s24 = sadd.s32 1, %s758_s17 }
   0x6   : > { %p38_p0 = scmp.ge.s32.totalorder %s36_s23, 2  ;;  %p169_p1 = scmp.ne.s32.totalorder %s758_s17, %s754_s16 }
   0x7   : > { %p170_p2 = scmp.eq.s32.totalorder %s603_s21, 1  ;;  %p175_p3 = scmp.ne.s32.totalorder %s754_s16, %s750_s15 }
   0x8   : > { %s943_s23 = smov (%p38_p0, %s36_s23), 0  ;;  %p176_p5 = scmp.eq.s32.totalorder %s604_s22, 1 }
   0x9   : > { %p841_p4 = por %p170_p2, %p169_p1  ;;  %s152_s26 = ssub.s32 %s766_s19, %s943_s23 }
   0xa   : > { %p607_p6 = scmp.ge.s32.totalorder %s770_s20, 1  ;;  %p157_p7 = scmp.eq.s32.totalorder %s152_s26, 0 }
   0xb   : > { %p848_p8 = por %p176_p5, %p175_p3  ;;  %p236_p9 = scmp.lt.s32.totalorder %s770_s20, 3 }
   0xc   : > { %s854_s28 = scalar_select %p157_p7, %s758_s17, %s159_s24  }
   0xd   : > { %p237_p10 = pnand %p607_p6, %p236_p9 }
   0xe   : > { %p286_p11 = scmp.lt.s32.totalorder (!%p237_p10), %s762_s18, 1  ;;  %v772_v2 = vmov (!%p237_p10), 0   ;;  %vm351_vm0 = vcmask (!%p237_p10), 64512   ;;  %s283_s21 = sand.u32 (!%p237_p10), 1, %s754_s16   ;;  %vm458_vm1 = vcmask (!%p237_p10), 130048  }
   0xf   : > { %240 = sbr.rel (%p237_p10) target bundleno = 394 (0x18a), region = 36  ;;  %691 = vset.pattern.permute.xlu1 (!%p237_p10), %v772_v2  ;;  %s608_s22 = sshll.u32 (!%p237_p10), %s283_s21, 4 }
  0x10   : > { %s285_s5 = scalar_lea.vmem (!%p237_p10), [#allocation2], %s608_s22 }
  0x11   : > { %s478_s6 = sshll.u32 (!%p237_p10), %s285_s5, 4  ;;  %s882_s6 = int_to_ptr.vmem [resolvable:$true] %s478_s6 }
  0x16   : > { %s858_s29 = scalar_select %p286_p11, %s762_s18, 1 }
  0x18   : > { %s609_s30 = sshll.u32 %s858_s29, 3  ;;  %s621_s11 = sshll.u32 %s858_s29, 4 }
  0x19   : > { %s292_s7 = scalar_lea.vmem %s930_s0, %s609_s30  ;;  %s299_s10 = scalar_lea.vmem %s931_s1, %s609_s30 }
  0x1a   : > { %v317_v0 = vld [vmem:[%s292_s7] sm:$0xff]  ;;  %s308_s14 = scalar_lea.vmem %s932_s2, %s621_s11  ;;  %s315_s30 = scalar_lea.vmem %s933_s3, %s858_s29 }
  0x1b   : > { %319 = vxpose.xlu0.b32.start.end [1/1] (short) (narrow) %v317_v0, 16  ;;  %v318_v1 = vld [vmem:[%s299_s10] sm:$0xff]  ;;  %v436_v3 = vld [vmem:[%s308_s14 + $0x8] sm:$0xff]  ;;  %s622_s7 = sshll.u32 %s762_s18, 8  ;;  %s884_s29 = scalar_lea.sflag [#allocation3], %s283_s21 }
  0x1c   : > { %626 = vmatprep.subr.mxu0 %v318_v1  ;;  %444 = vperm.xlu1 %691, %v436_v3   ;;  %v435_v4 = vld [vmem:[%s308_s14] sm:$0xff]  ;;  %s880_s10 = scalar_lea.hbm %s934_s4, %s622_s7  ;;  %s692_s18 = scalar_lea.vmem %s882_s6, 256 }
  0x1d   : > { %627 = vmatpush3.msra.mxu0 %v318_v1  ;;  %v615_v13 = vld [vmem:[%s315_s30] ss:$0 sm:$0xff]  ;;  %p693_p12 = scmp.ne.s32.totalorder %s882_s6, %s692_s18  ;;  %s773_s11 = smov [#allocation2]  }
  0x1e   : > { %s696_s12 = sshll.u32 %s773_s11, 4  ;;  %s697_s12 = int_to_ptr.vmem [resolvable:$false] %s696_s12 }
  0x1f   : > { %p694_p13 = pnand %p693_p12, %p841_p4  ;;  %s698_s13 = scalar_lea.vmem %s697_s12, 512 }
  0x20   : > { %p699_p1 = scmp.lt.s32.totalorder %s882_s6, %s697_s12  ;;  %p700_p2 = scmp.lt.s32.totalorder %s698_s13, %s692_s18 }
  0x21   : > { %p695_p0 = pneg %p694_p13 }
  0x22   : > { %p701_p3 = por %p700_p2, %p699_p1 }
  0x24   : > { %p702_p5 = pnand %p701_p3, %p695_p0 }
  0x44   : > { %690 = vset.pattern.permute.xlu0 %v772_v2 }
  0x48   : > { %439 = vperm.xlu0 %690, %v435_v4  }
  0x9b   : > { %v335_v5 = vpop.trf.xlu0  ;;  %v445_v8 = vpop.permute.xlu1 %444 }
  0x9c   : > { %628 = vmatprep.mubr.msk.f32.mxu0 %vm351_vm0, %v335_v5 }
  0x9f   : > { %v336_v6 = vpop.trf.xlu0 }
  0xa0   : > { %629 = vmatmul.mubr.msk.f32.vlgmr.msra.gmra.mrb[0].mxu0 %vm351_vm0, %v336_v6 }
  0xc7   : > { %v440_v11 = vpop.permute.xlu0 %439 }
 0x173   : > { %v630_v7 = vpop.f32.mrb[0].mxu0 }
 0x174   : > { %v434_v9 = vmul.f32 2.0, %v630_v7  ;;  %v424_v10 = vpop.f32.mrb[1].mxu0 }
 0x175   : > { %v433_v12 = vmul.f32 2.0, %v424_v10 }
 0x176   : > { %v448_v14 = vsub.f32 %v434_v9, %v445_v8 }
 0x177   : > { %v447_v15 = vsub.f32 %v433_v12, %v440_v11 }
 0x178   : > { %v457_v16 = vsub.f32 %v448_v14, %v615_v13 }
 0x179   : > { %v456_v17 = vsub.f32 %v447_v15, %v615_v13 }
 0x17a   : > { %460 = vst.msk [vmem:[%s285_s5 + $0x8] sm:$0xff] %vm458_vm1, %v457_v16 }
 0x17b   : > { %459 = vst.msk [vmem:[%s285_s5] sm:$0xff] %vm458_vm1, %v456_v17 }
 0x17c   : > { %705 = shalt.err (!%p702_p5)
}
 0x17d   : > { %s706_s14 = scalar_lea.hbm %s880_s10, 256  ;;  %s710_s24 = scalar_lea.hbm %s934_s4, 512 }
 0x17e   : > { %p707_p6 = scmp.ne.s32.totalorder %s880_s10, %s706_s14  ;;  %p711_p10 = scmp.lt.u32.totalorder %s880_s10, %s934_s4 }
 0x17f   : > { %p712_p11 = scmp.lt.u32.totalorder %s710_s24, %s706_s14  ;;  %p714_p13 = scmp.lt.u32.totalorder %s706_s14, %s880_s10 }
 0x180   : > { %p708_p7 = pnand %p707_p6, %p841_p4 }
 0x181   : > { %p713_p12 = por %p712_p11, %p711_p10 }
 0x182   : > { %p709_p9 = pneg %p708_p7 }
 0x183   : > { %p715_p0 = por %p714_p13, %p713_p12 }
 0x185   : > { %p716_p1 = pnand %p715_p0, %p709_p9 }
 0x187   : > { %719 = shalt.err (!%p716_p1)
}
 0x188   : > { %s774_s5 = smov 128   ;;  %s775_s7 = smov 8  }
 0x189   : > { %631 = dma.vmem_to_hbm [thread:$0]  (%p841_p4), %s882_s6, 256, %s880_s10, %s884_s29, %s774_s5, %s774_s5, %s775_s7  }
 0x18a PF: > { %p637_p2 = scmp.ge.s32.totalorder %s770_s20, 2  ;;  %s493_s8 = sand.u32 1, %s750_s15  }
 0x18b   : > { %s494_s9 = scalar_lea.sflag [#allocation3], %s493_s8 }
 0x18c   : > { %p634_p3 = pnand %p637_p2, %p848_p8 }
 0x18e   : > { %745 = dma.done.wait (!%p634_p3), %s494_s9, 256  }
 0x18f   : > { %747 = vsyncadd (!%p634_p3), %s494_s9, 4294967040  ;;  %s17_s20 = sadd.s32 1, %s770_s20   ;;  %s937_s15 = smov %s754_s16 }
 0x190   : > { %p14_p5 = scmp.ge.s32.totalorder %s17_s20, 4   ;;  %s938_s16 = smov %s758_s17 }
 0x191   : > { %s939_s17 = smov %s854_s28  ;;  %s940_s18 = smov %s766_s19 }
 0x192   : > { %s941_s19 = smov %s943_s23  ;;  %16 = sbr.rel (!%p14_p5) target bundleno = 4 (0x4), region = 80 }
 0x199   :  { %499 = vsyncpa [#allocation3], 1 }
 0x19a   :  { %501 = vsyncpa [#allocation3 + $0x1], 1 }

</bundles_post_ra>
